<compile_context>
chip_gen: v7x
topology: tpu7x:2x2x1
jax: 0.10.0
libtpu: 0.0.40
codegen_flags: <defaults>
</compile_context>

<pallas_src>
import functools

import jax
import jax.numpy as jnp
from jax.experimental import pallas as pl
from jax.experimental.pallas import tpu as pltpu


def _round_up(n, m):
    return (n + m - 1) // m * m


def _cdiv(a, b):
    return (a + b - 1) // b


def _mlp_kernel(x_ref, w1_ref, b1_ref, w2_ref, b2_ref, o_ref, *,
                in_size, hidden, group=8):
    """One batch tile of the 2-layer MLP.

    x_ref : [in_size, TB]     (batch on lanes)
    w1_ref: [hidden, in_size] (hidden padded to a multiple of `group`)
    b1_ref: [hidden, 1]
    w2_ref: [hidden, 1]
    b2_ref: [1, 1]            (SMEM scalar)
    o_ref : [1, TB]           (lane-dense output row)
    """
    x = x_ref[...]
    tb = x.shape[1]
    z = jnp.zeros((1, tb), jnp.float32)

    # Process the hidden dim in 8-sublane groups: live set per group is
    # [group, TB], so raising TB does not turn the kernel spill/VMEM bound.
    for g in range(0, hidden, group):
        w1_g = w1_ref[g:g + group, :]                       # [group, in_size]
        # Layer 1 on the VPU: h[j, b] = b1[j] + sum_k w1[j, k] * x[k, b]
        h = b1_ref[g:g + group, :] + w1_g[:, 0:1] * x[0:1, :]
        for k in range(1, in_size):                         # in_size tiny; static unroll
            h = h + w1_g[:, k:k + 1] * x[k:k + 1, :]
        h = jnp.maximum(h, 0.0)                             # ReLU
        # Layer 2 contribution: weighted sublane reduction (XLU) -> [1, TB]
        z = z + jnp.sum(h * w2_ref[g:g + group, :], axis=0, keepdims=True)

    # Sigmoid; exp runs on the EUP.  Kept exact (no approx reciprocal / bf16)
    # so the 1e-5 parity with the PyTorch reference holds.
    o_ref[...] = jax.nn.sigmoid(z + b2_ref[0, 0])


def _choose_tile(batch, max_lane_tile):
    """Balanced, 128-aligned lane tile.

    * n_steps chosen so the last tile wastes at most ~128 lanes per step
      (instead of padding B up to a multiple of a huge fixed tile).
    * For batch > 256 keep >= 2 grid steps so both v7x TensorCores get work
      (no effect on v5e/v6e, which have a single TensorCore).
    """
    max_lane_tile = max(128, _round_up(max_lane_tile, 128))
    n_steps = _cdiv(batch, max_lane_tile)
    if batch > 256:
        n_steps = max(n_steps, 2)
    tb = min(_round_up(_cdiv(batch, n_steps), 128), max_lane_tile)
    n_steps = _cdiv(batch, tb)
    return tb, n_steps


def _forward_lanes(xt, w1, b1, w2, b2, *, max_lane_tile):
    """Core forward. xt: [in_size, B] (batch on lanes). Returns [1, B] f32."""
    in_size, batch = xt.shape
    num_nodes = w1.shape[0]
    f32 = jnp.float32

    # Pad hidden dim to a sublane multiple; zero rows/bias/weights contribute 0.
    hidden = _round_up(num_nodes, 8)
    w1_p = jnp.zeros((hidden, in_size), f32).at[:num_nodes, :].set(w1.astype(f32))
    b1_p = jnp.zeros((hidden, 1), f32).at[:num_nodes, 0].set(b1.astype(f32))
    w2_p = jnp.zeros((hidden, 1), f32).at[:num_nodes, 0].set(
        w2.reshape(-1).astype(f32))
    b2_p = jnp.asarray(b2, f32).reshape(1, 1)

    tb, n_steps = _choose_tile(batch, max_lane_tile)
    b_pad = tb * n_steps

    xt = xt.astype(f32)
    if b_pad != batch:
        # Only the ragged last tile is padded (<= ~n_steps*128 extra lanes);
        # under jit this fuses with the caller-side transpose into one pass.
        xt = jnp.zeros((in_size, b_pad), f32).at[:, :batch].set(xt)

    # Explicit VMEM budget: double-buffered x/out tiles + resident weights +
    # headroom for the strip-mined [group, TB] intermediates.  Never below the
    # v6e/v7x scoped default (32 MiB), never above v7x physical (64 MiB).
    vmem_limit = (2 * (in_size + 1) * tb * 4          # pipelined x + out buffers
                  + 8 * 8 * tb * 4                    # group temporaries headroom
                  + hidden * (in_size + 2) * 4        # resident w1 / b1 / w2
                  + (2 << 20))                        # misc compiler scratch
    vmem_limit = int(min(max(vmem_limit, 32 << 20), 48 << 20))

    kernel = functools.partial(_mlp_kernel, in_size=in_size, hidden=hidden)
    out = pl.pallas_call(
        kernel,
        out_shape=jax.ShapeDtypeStruct((1, b_pad), f32),
        grid=(n_steps,),
        in_specs=[
            pl.BlockSpec((in_size, tb), lambda i: (0, i)),        # x tile (pipelined)
            pl.BlockSpec((hidden, in_size), lambda i: (0, 0)),    # w1 (resident)
            pl.BlockSpec((hidden, 1), lambda i: (0, 0)),          # b1 (resident)
            pl.BlockSpec((hidden, 1), lambda i: (0, 0)),          # w2 (resident)
            pl.BlockSpec(memory_space=pltpu.MemorySpace.SMEM),    # b2 scalar
        ],
        out_specs=pl.BlockSpec((1, tb), lambda i: (0, i)),        # lane-dense output
        compiler_params=pltpu.CompilerParams(
            dimension_semantics=("parallel",),   # shard batch grid across v7x TCs
            vmem_limit_bytes=vmem_limit,
        ),
    )(xt, w1_p, b1_p, w2_p, b2_p)

    return out[:, :batch]


@functools.partial(jax.jit, static_argnames=("max_lane_tile",))
def classifier_forward_t(xt, w1, b1, w2, b2, max_lane_tile=32768):
    """Forward with batch-on-lanes input xt: [in_size, B]. Returns [1, B].

    Use this entry point when the caller can supply x already transposed, so
    no wrapper-side relayout of x is needed at all.
    """
    return _forward_lanes(xt, w1, b1, w2, b2, max_lane_tile=max_lane_tile)


@functools.partial(jax.jit, static_argnames=("max_lane_tile",))
def classifier_forward(x, w1, b1, w2, b2, max_lane_tile=32768):
    """PyTorch-compatible forward: sigmoid(relu(x @ w1.T + b1) @ w2.T + b2).

    Args (PyTorch-native shapes):
      x : [B, in_size], w1: [num_nodes, in_size], b1: [num_nodes],
      w2: [1, num_nodes], b2: [1]
    Returns: [B, 1] float32
    """
    row = _forward_lanes(x.T, w1, b1, w2, b2, max_lane_tile=max_lane_tile)
    return row.reshape(-1, 1)      # [1, B] -> [B, 1], layout-trivial reshape


def init_params(key, in_size=2, num_nodes=30):
    """Deterministic synthetic parameters in PyTorch-native shapes."""
    k1, k2, k3, k4 = jax.random.split(key, 4)
    bound1 = 1.0 / jnp.sqrt(in_size)
    bound2 = 1.0 / jnp.sqrt(num_nodes)
    w1 = jax.random.uniform(k1, (num_nodes, in_size), jnp.float32, -bound1, bound1)
    b1 = jax.random.uniform(k2, (num_nodes,), jnp.float32, -bound1, bound1)
    w2 = jax.random.uniform(k3, (1, num_nodes), jnp.float32, -bound2, bound2)
    b2 = jax.random.uniform(k4, (1,), jnp.float32, -bound2, bound2)
    return w1, b1, w2, b2


def _reference(x, w1, b1, w2, b2):
    h = jnp.maximum(x @ w1.T + b1[None, :], 0.0)
    return jax.nn.sigmoid(h @ w2.T + b2[None, :])


if __name__ == "__main__":
    key = jax.random.PRNGKey(0)
    kx, kp, kx2 = jax.random.split(key, 3)

    in_size, num_nodes, batch = 2, 30, 8
    x = jax.random.normal(kx, (batch, in_size), jnp.float32)
    w1, b1, w2, b2 = init_params(kp, in_size, num_nodes)

    out = jax.block_until_ready(classifier_forward(x, w1, b1, w2, b2))
    ref = _reference(x, w1, b1, w2, b2)
    assert out.shape == (batch, 1)
    assert jnp.allclose(out, ref, atol=1e-5, rtol=1e-5)

    # Larger ragged batch: default tiling -> balanced >=2-step grid.
    batch2 = 600
    x2 = jax.random.normal(kx2, (batch2, in_size), jnp.float32)
    ref2 = _reference(x2, w1, b1, w2, b2)
    out2 = jax.block_until_ready(classifier_forward(x2, w1, b1, w2, b2))
    assert out2.shape == (batch2, 1)
    assert jnp.allclose(out2, ref2, atol=1e-5, rtol=1e-5)

    # Forced small lane tile -> multi-step grid + last-tile padding path.
    out3 = jax.block_until_ready(
        classifier_forward(x2, w1, b1, w2, b2, max_lane_tile=256))
    assert jnp.allclose(out3, ref2, atol=1e-5, rtol=1e-5)

    # Transposed-layout entry point (skips the wrapper transpose entirely).
    out4 = jax.block_until_ready(classifier_forward_t(x2.T, w1, b1, w2, b2))
    assert out4.shape == (1, batch2)
    assert jnp.allclose(out4[0], ref2[:, 0], atol=1e-5, rtol=1e-5)

    print("KERNEL_OK")
</pallas_src>

<mosaic_0001>
module attributes {stable_mosaic.version = 11 : i64} {
  func.func @_mlp_kernel(%arg0: i32, %arg1: memref<2x128xf32, #tpu.memory_space<vmem>>, %arg2: memref<32x2xf32, #tpu.memory_space<vmem>>, %arg3: memref<32x1xf32, #tpu.memory_space<vmem>>, %arg4: memref<32x1xf32, #tpu.memory_space<vmem>>, %arg5: memref<1x1xf32, #tpu.memory_space<smem>>, %arg6: memref<1x128xf32, #tpu.memory_space<vmem>>) attributes {dimension_semantics = [#tpu.dimension_semantics<parallel>], iteration_bounds = array<i64: 1>, scalar_prefetch = 0 : i64, scratch_operands = 0 : i64, tpu.core_type = #tpu.core_type<tc>, window_params = [{transform_indices = @transform_0, window_bounds = array<i64: 2, 128>}, {pipeline_mode = #tpu.pipeline_mode<synchronous>, transform_indices = @transform_1, window_bounds = array<i64: 32, 2>}, {pipeline_mode = #tpu.pipeline_mode<synchronous>, transform_indices = @transform_2, window_bounds = array<i64: 32, 1>}, {pipeline_mode = #tpu.pipeline_mode<synchronous>, transform_indices = @transform_3, window_bounds = array<i64: 32, 1>}, {transform_indices = @transform_4, window_bounds = array<i64: 1, 1>}, {transform_indices = @transform_5, window_bounds = array<i64: 1, 128>}]} {
    %c0 = arith.constant 0 : index
    %c0_0 = arith.constant 0 : index
    %0 = vector.load %arg1[%c0, %c0_0] : memref<2x128xf32, #tpu.memory_space<vmem>>, vector<2x128xf32>
    %cst = arith.constant 0.000000e+00 : f32
    %1 = vector.broadcast %cst : f32 to vector<1x128xf32>
    %c0_1 = arith.constant 0 : index
    %c0_2 = arith.constant 0 : index
    %2 = vector.load %arg2[%c0_1, %c0_2] : memref<32x2xf32, #tpu.memory_space<vmem>>, vector<8x2xf32>
    %c0_3 = arith.constant 0 : index
    %c0_4 = arith.constant 0 : index
    %3 = vector.load %arg3[%c0_3, %c0_4] : memref<32x1xf32, #tpu.memory_space<vmem>>, vector<8x1xf32>
    %4 = vector.extract_strided_slice %2 {offsets = [0, 0], sizes = [8, 1], strides = [1, 1]} : vector<8x2xf32> to vector<8x1xf32>
    %5 = vector.extract_strided_slice %0 {offsets = [0, 0], sizes = [1, 128], strides = [1, 1]} : vector<2x128xf32> to vector<1x128xf32>
    %6 = vector.broadcast %4 : vector<8x1xf32> to vector<8x128xf32>
    %7 = vector.broadcast %5 : vector<1x128xf32> to vector<8x128xf32>
    %8 = arith.mulf %6, %7 : vector<8x128xf32>
    %9 = vector.broadcast %3 : vector<8x1xf32> to vector<8x128xf32>
    %10 = arith.addf %9, %8 : vector<8x128xf32>
    %11 = vector.extract_strided_slice %2 {offsets = [0, 1], sizes = [8, 1], strides = [1, 1]} : vector<8x2xf32> to vector<8x1xf32>
    %12 = vector.extract_strided_slice %0 {offsets = [1, 0], sizes = [1, 128], strides = [1, 1]} : vector<2x128xf32> to vector<1x128xf32>
    %13 = vector.broadcast %11 : vector<8x1xf32> to vector<8x128xf32>
    %14 = vector.broadcast %12 : vector<1x128xf32> to vector<8x128xf32>
    %15 = arith.mulf %13, %14 : vector<8x128xf32>
    %16 = arith.addf %10, %15 : vector<8x128xf32>
    %cst_5 = arith.constant 0.000000e+00 : f32
    %17 = vector.broadcast %cst_5 : f32 to vector<8x128xf32>
    %18 = arith.maximumf %16, %17 : vector<8x128xf32>
    %c0_6 = arith.constant 0 : index
    %c0_7 = arith.constant 0 : index
    %19 = vector.load %arg4[%c0_6, %c0_7] : memref<32x1xf32, #tpu.memory_space<vmem>>, vector<8x1xf32>
    %20 = vector.broadcast %19 : vector<8x1xf32> to vector<8x128xf32>
    %21 = arith.mulf %18, %20 : vector<8x128xf32>
    %cst_8 = arith.constant dense<0.000000e+00> : vector<128xf32>
    %22 = vector.multi_reduction <add>, %21, %cst_8 [0] : vector<8x128xf32> to vector<128xf32>
    %23 = vector.shape_cast %22 : vector<128xf32> to vector<1x128xf32>
    %24 = arith.addf %1, %23 : vector<1x128xf32>
    %c8 = arith.constant 8 : index
    %c0_9 = arith.constant 0 : index
    %25 = vector.load %arg2[%c8, %c0_9] : memref<32x2xf32, #tpu.memory_space<vmem>>, vector<8x2xf32>
    %c8_10 = arith.constant 8 : index
    %c0_11 = arith.constant 0 : index
    %26 = vector.load %arg3[%c8_10, %c0_11] : memref<32x1xf32, #tpu.memory_space<vmem>>, vector<8x1xf32>
    %27 = vector.extract_strided_slice %25 {offsets = [0, 0], sizes = [8, 1], strides = [1, 1]} : vector<8x2xf32> to vector<8x1xf32>
    %28 = vector.extract_strided_slice %0 {offsets = [0, 0], sizes = [1, 128], strides = [1, 1]} : vector<2x128xf32> to vector<1x128xf32>
    %29 = vector.broadcast %27 : vector<8x1xf32> to vector<8x128xf32>
    %30 = vector.broadcast %28 : vector<1x128xf32> to vector<8x128xf32>
    %31 = arith.mulf %29, %30 : vector<8x128xf32>
    %32 = vector.broadcast %26 : vector<8x1xf32> to vector<8x128xf32>
    %33 = arith.addf %32, %31 : vector<8x128xf32>
    %34 = vector.extract_strided_slice %25 {offsets = [0, 1], sizes = [8, 1], strides = [1, 1]} : vector<8x2xf32> to vector<8x1xf32>
    %35 = vector.extract_strided_slice %0 {offsets = [1, 0], sizes = [1, 128], strides = [1, 1]} : vector<2x128xf32> to vector<1x128xf32>
    %36 = vector.broadcast %34 : vector<8x1xf32> to vector<8x128xf32>
    %37 = vector.broadcast %35 : vector<1x128xf32> to vector<8x128xf32>
    %38 = arith.mulf %36, %37 : vector<8x128xf32>
    %39 = arith.addf %33, %38 : vector<8x128xf32>
    %cst_12 = arith.constant 0.000000e+00 : f32
    %40 = vector.broadcast %cst_12 : f32 to vector<8x128xf32>
    %41 = arith.maximumf %39, %40 : vector<8x128xf32>
    %c8_13 = arith.constant 8 : index
    %c0_14 = arith.constant 0 : index
    %42 = vector.load %arg4[%c8_13, %c0_14] : memref<32x1xf32, #tpu.memory_space<vmem>>, vector<8x1xf32>
    %43 = vector.broadcast %42 : vector<8x1xf32> to vector<8x128xf32>
    %44 = arith.mulf %41, %43 : vector<8x128xf32>
    %cst_15 = arith.constant dense<0.000000e+00> : vector<128xf32>
    %45 = vector.multi_reduction <add>, %44, %cst_15 [0] : vector<8x128xf32> to vector<128xf32>
    %46 = vector.shape_cast %45 : vector<128xf32> to vector<1x128xf32>
    %47 = arith.addf %24, %46 : vector<1x128xf32>
    %c16 = arith.constant 16 : index
    %c0_16 = arith.constant 0 : index
    %48 = vector.load %arg2[%c16, %c0_16] : memref<32x2xf32, #tpu.memory_space<vmem>>, vector<8x2xf32>
    %c16_17 = arith.constant 16 : index
    %c0_18 = arith.constant 0 : index
    %49 = vector.load %arg3[%c16_17, %c0_18] : memref<32x1xf32, #tpu.memory_space<vmem>>, vector<8x1xf32>
    %50 = vector.extract_strided_slice %48 {offsets = [0, 0], sizes = [8, 1], strides = [1, 1]} : vector<8x2xf32> to vector<8x1xf32>
    %51 = vector.extract_strided_slice %0 {offsets = [0, 0], sizes = [1, 128], strides = [1, 1]} : vector<2x128xf32> to vector<1x128xf32>
    %52 = vector.broadcast %50 : vector<8x1xf32> to vector<8x128xf32>
    %53 = vector.broadcast %51 : vector<1x128xf32> to vector<8x128xf32>
    %54 = arith.mulf %52, %53 : vector<8x128xf32>
    %55 = vector.broadcast %49 : vector<8x1xf32> to vector<8x128xf32>
    %56 = arith.addf %55, %54 : vector<8x128xf32>
    %57 = vector.extract_strided_slice %48 {offsets = [0, 1], sizes = [8, 1], strides = [1, 1]} : vector<8x2xf32> to vector<8x1xf32>
    %58 = vector.extract_strided_slice %0 {offsets = [1, 0], sizes = [1, 128], strides = [1, 1]} : vector<2x128xf32> to vector<1x128xf32>
    %59 = vector.broadcast %57 : vector<8x1xf32> to vector<8x128xf32>
    %60 = vector.broadcast %58 : vector<1x128xf32> to vector<8x128xf32>
    %61 = arith.mulf %59, %60 : vector<8x128xf32>
    %62 = arith.addf %56, %61 : vector<8x128xf32>
    %cst_19 = arith.constant 0.000000e+00 : f32
    %63 = vector.broadcast %cst_19 : f32 to vector<8x128xf32>
    %64 = arith.maximumf %62, %63 : vector<8x128xf32>
    %c16_20 = arith.constant 16 : index
    %c0_21 = arith.constant 0 : index
    %65 = vector.load %arg4[%c16_20, %c0_21] : memref<32x1xf32, #tpu.memory_space<vmem>>, vector<8x1xf32>
    %66 = vector.broadcast %65 : vector<8x1xf32> to vector<8x128xf32>
    %67 = arith.mulf %64, %66 : vector<8x128xf32>
    %cst_22 = arith.constant dense<0.000000e+00> : vector<128xf32>
    %68 = vector.multi_reduction <add>, %67, %cst_22 [0] : vector<8x128xf32> to vector<128xf32>
    %69 = vector.shape_cast %68 : vector<128xf32> to vector<1x128xf32>
    %70 = arith.addf %47, %69 : vector<1x128xf32>
    %c24 = arith.constant 24 : index
    %c0_23 = arith.constant 0 : index
    %71 = vector.load %arg2[%c24, %c0_23] : memref<32x2xf32, #tpu.memory_space<vmem>>, vector<8x2xf32>
    %c24_24 = arith.constant 24 : index
    %c0_25 = arith.constant 0 : index
    %72 = vector.load %arg3[%c24_24, %c0_25] : memref<32x1xf32, #tpu.memory_space<vmem>>, vector<8x1xf32>
    %73 = vector.extract_strided_slice %71 {offsets = [0, 0], sizes = [8, 1], strides = [1, 1]} : vector<8x2xf32> to vector<8x1xf32>
    %74 = vector.extract_strided_slice %0 {offsets = [0, 0], sizes = [1, 128], strides = [1, 1]} : vector<2x128xf32> to vector<1x128xf32>
    %75 = vector.broadcast %73 : vector<8x1xf32> to vector<8x128xf32>
    %76 = vector.broadcast %74 : vector<1x128xf32> to vector<8x128xf32>
    %77 = arith.mulf %75, %76 : vector<8x128xf32>
    %78 = vector.broadcast %72 : vector<8x1xf32> to vector<8x128xf32>
    %79 = arith.addf %78, %77 : vector<8x128xf32>
    %80 = vector.extract_strided_slice %71 {offsets = [0, 1], sizes = [8, 1], strides = [1, 1]} : vector<8x2xf32> to vector<8x1xf32>
    %81 = vector.extract_strided_slice %0 {offsets = [1, 0], sizes = [1, 128], strides = [1, 1]} : vector<2x128xf32> to vector<1x128xf32>
    %82 = vector.broadcast %80 : vector<8x1xf32> to vector<8x128xf32>
    %83 = vector.broadcast %81 : vector<1x128xf32> to vector<8x128xf32>
    %84 = arith.mulf %82, %83 : vector<8x128xf32>
    %85 = arith.addf %79, %84 : vector<8x128xf32>
    %cst_26 = arith.constant 0.000000e+00 : f32
    %86 = vector.broadcast %cst_26 : f32 to vector<8x128xf32>
    %87 = arith.maximumf %85, %86 : vector<8x128xf32>
    %c24_27 = arith.constant 24 : index
    %c0_28 = arith.constant 0 : index
    %88 = vector.load %arg4[%c24_27, %c0_28] : memref<32x1xf32, #tpu.memory_space<vmem>>, vector<8x1xf32>
    %89 = vector.broadcast %88 : vector<8x1xf32> to vector<8x128xf32>
    %90 = arith.mulf %87, %89 : vector<8x128xf32>
    %cst_29 = arith.constant dense<0.000000e+00> : vector<128xf32>
    %91 = vector.multi_reduction <add>, %90, %cst_29 [0] : vector<8x128xf32> to vector<128xf32>
    %92 = vector.shape_cast %91 : vector<128xf32> to vector<1x128xf32>
    %93 = arith.addf %70, %92 : vector<1x128xf32>
    %c0_30 = arith.constant 0 : index
    %c0_31 = arith.constant 0 : index
    %94 = memref.load %arg5[%c0_30, %c0_31] : memref<1x1xf32, #tpu.memory_space<smem>>
    %95 = vector.broadcast %94 : f32 to vector<1x128xf32>
    %96 = arith.addf %93, %95 : vector<1x128xf32>
    %97 = arith.negf %96 : vector<1x128xf32>
    %98 = math.exp %97 : vector<1x128xf32>
    %cst_32 = arith.constant 1.000000e+00 : f32
    %99 = vector.broadcast %cst_32 : f32 to vector<1x128xf32>
    %100 = arith.addf %99, %98 : vector<1x128xf32>
    %101 = arith.divf %99, %100 : vector<1x128xf32>
    %c0_33 = arith.constant 0 : index
    %c0_34 = arith.constant 0 : index
    %102 = vector.load %arg6[%c0_33, %c0_34] : memref<1x128xf32, #tpu.memory_space<vmem>>, vector<1x128xf32>
    tpu.vector_store %arg6[%c0_33, %c0_34], %101 {strides = array<i32>} : memref<1x128xf32, #tpu.memory_space<vmem>>, vector<1x128xf32>,
    return
  }
  func.func @transform_0(%arg0: i32) -> (i32, i32) {
    %c0_i32 = arith.constant 0 : i32
    %c0_i32_0 = arith.constant 0 : i32
    return %c0_i32, %arg0 : i32, i32
  }
  func.func @transform_1(%arg0: i32) -> (i32, i32) {
    %c0_i32 = arith.constant 0 : i32
    %c0_i32_0 = arith.constant 0 : i32
    %c0_i32_1 = arith.constant 0 : i32
    return %c0_i32, %c0_i32_0 : i32, i32
  }
  func.func @transform_2(%arg0: i32) -> (i32, i32) {
    %c0_i32 = arith.constant 0 : i32
    %c0_i32_0 = arith.constant 0 : i32
    %c0_i32_1 = arith.constant 0 : i32
    return %c0_i32, %c0_i32_0 : i32, i32
  }
  func.func @transform_3(%arg0: i32) -> (i32, i32) {
    %c0_i32 = arith.constant 0 : i32
    %c0_i32_0 = arith.constant 0 : i32
    %c0_i32_1 = arith.constant 0 : i32
    return %c0_i32, %c0_i32_0 : i32, i32
  }
  func.func @transform_4(%arg0: i32) -> (i32, i32) {
    %c0_i32 = arith.constant 0 : i32
    %c0_i32_0 = arith.constant 0 : i32
    %c0_i32_1 = arith.constant 0 : i32
    return %c0_i32, %c0_i32_0 : i32, i32
  }
  func.func @transform_5(%arg0: i32) -> (i32, i32) {
    %c0_i32 = arith.constant 0 : i32
    %c0_i32_0 = arith.constant 0 : i32
    return %c0_i32, %arg0 : i32, i32
  }
}

</mosaic_0001>

<bundles_post_ra>
// kernel: classifier_forward.1
= control target key start
LH: loop header
LB: loop body
LE: loop exit
PB: predicated region body
PF: predicated region fallthrough
CT: control target
= control target key end

     0   :  { %v197_v0 = vmov 0   ;;  %v198_v4 = vmov 1   ;;  %v29_v14 = vlaneseq  ;;  %s274_s2 = inlined_call_operand.vmem [shape: f32[32,1], index: 2, kind: input, shape index: {}]   ;;  %s275_s1 = inlined_call_operand.vmem [shape: f32[32,2], index: 1, kind: input, shape index: {}]   ;;  %s276_s3 = inlined_call_operand.vmem [shape: f32[32,1], index: 3, kind: input, shape index: {}]   ;;  %s277_s0 = inlined_call_operand.vmem [shape: f32[2,128], index: 0, kind: input, shape index: {}]   ;;  %s278_s4 = inlined_call_operand.<no memory space> [shape: f32[1,1], index: 4, kind: input, shape index: {}]   ;;  %s279_s5 = inlined_call_operand.vmem [shape: f32[1,128], index: 5, kind: output, shape index: {}]  }
   0x1   :  { %188 = vset.pattern.permute.xlu1 %v197_v0  ;;  %187 = vset.pattern.permute.xlu0 %v197_v0  ;;  %v23_v1 = vld [vmem:[%s274_s2] sm:$0xff]  ;;  %v65_v3 = vld [vmem:[%s275_s1 + $0x8] sm:$0xff]  ;;  %v100_v6 = vld [vmem:[%s275_s1 + $0x10] sm:$0xff] }
   0x2   :  { %v22_v2 = vld [vmem:[%s275_s1] sm:$0xff]  ;;  %36 = vperm.xlu1 %188, %v23_v1   ;;  %v66_v5 = vld [vmem:[%s274_s2 + $0x8] sm:$0xff]  ;;  %v101_v7 = vld [vmem:[%s274_s2 + $0x10] sm:$0xff]  ;;  %v30_v17 = vshrl.u32 %v29_v14, 7 }
   0x3   :  { %26 = vperm.xlu0 %187, %v22_v2   ;;  %v135_v8 = vld [vmem:[%s275_s1 + $0x18] sm:$0xff]  ;;  %v51_v10 = vld [vmem:[%s276_s3] sm:$0xff]  ;;  %v86_v11 = vld [vmem:[%s276_s3 + $0x8] sm:$0xff] }
   0x4   :  { %v136_v9 = vld [vmem:[%s274_s2 + $0x18] sm:$0xff]  ;;  %v121_v12 = vld [vmem:[%s276_s3 + $0x10] sm:$0xff]  ;;  %v31_v20 = vsub.s32 0, %v30_v17  ;;  %v21_v21 = vld [vmem:[%s277_s0] sm:$0x3]  ;;  %v46_v22 = vsub.s32 1, %v30_v17 }
   0x5   :  { %v156_v13 = vld [vmem:[%s276_s3 + $0x18] sm:$0xff] }
   0x6   :  { %189 = vset.pattern.permute.xlu1 %v198_v4  ;;  %v32_v25 = vrot.slane %v21_v21, %v31_v20  ;;  %v47_v26 = vrot.slane %v21_v21, %v46_v22 }
   0x7   :  { %69 = vperm.xlu0 %187, %v65_v3   ;;  %41 = vperm.xlu1 %189, %v22_v2  }
   0xb   :  { %75 = vperm.xlu0 %187, %v66_v5   ;;  %80 = vperm.xlu1 %189, %v65_v3  }
   0xf   :  { %104 = vperm.xlu0 %187, %v100_v6   ;;  %190 = vset.pattern.permute.xlu1 %v197_v0 }
  0x10   :  { %110 = vperm.xlu1 %190, %v101_v7  }
  0x13   :  { %191 = vset.pattern.permute.xlu0 %v198_v4 }
  0x14   :  { %115 = vperm.xlu0 %191, %v100_v6   ;;  %139 = vperm.xlu1 %190, %v135_v8  }
  0x18   :  { %150 = vperm.xlu0 %191, %v135_v8   ;;  %145 = vperm.xlu1 %190, %v136_v9  }
  0x1c   :  { %192 = vset.pattern.permute.xlu0 %v197_v0  ;;  %54 = vperm.xlu1 %190, %v51_v10  }
  0x1d   :  { %89 = vperm.xlu0 %192, %v86_v11  }
  0x20   :  { %124 = vperm.xlu1 %190, %v121_v12  }
  0x24   :  { %159 = vperm.xlu1 %190, %v156_v13  }
  0x81   :  { %v37_v15 = vpop.permute.xlu1 %36 }
  0x82   :  { %v27_v16 = vpop.permute.xlu0 %26 }
  0x83   :  { %v33_v28 = vmul.f32 %v32_v25, %v27_v16 }
  0x85   :  { %v39_v35 = vadd.f32 %v37_v15, %v33_v28 }
  0x86   :  { %v70_v18 = vpop.permute.xlu0 %69  ;;  %v42_v19 = vpop.permute.xlu1 %41 }
  0x87   :  { %v72_v30 = vmul.f32 %v70_v18, %v32_v25  ;;  %v48_v31 = vmul.f32 %v47_v26, %v42_v19 }
  0x89   :  { %v49_v38 = vadd.f32 %v48_v31, %v39_v35 }
  0x8a   :  { %v76_v23 = vpop.permute.xlu0 %75  ;;  %v81_v24 = vpop.permute.xlu1 %80 }
  0x8b   :  { %v78_v32 = vadd.f32 %v76_v23, %v72_v30  ;;  %v83_v33 = vmul.f32 %v81_v24, %v47_v26  ;;  %v50_v45 = vmax.f32 %v49_v38, 0.0  ;;  %v171_v23 = vstv %s278_s4 }
  0x8d   :  { %v84_v39 = vadd.f32 %v83_v33, %v78_v32 }
  0x8e   :  { %v105_v27 = vpop.permute.xlu0 %104 }
  0x8f   :  { %v111_v29 = vpop.permute.xlu1 %110  ;;  %v107_v37 = vmul.f32 %v105_v27, %v32_v25  ;;  %v85_v49 = vmax.f32 %v84_v39, 0.0 }
  0x91   :  { %v113_v43 = vadd.f32 %v111_v29, %v107_v37 }
  0x93   :  { %v116_v34 = vpop.permute.xlu0 %115  ;;  %v140_v36 = vpop.permute.xlu1 %139 }
  0x94   :  { %v118_v40 = vmul.f32 %v116_v34, %v47_v26  ;;  %v142_v44 = vmul.f32 %v140_v36, %v32_v25 }
  0x96   :  { %v119_v46 = vadd.f32 %v118_v40, %v113_v43 }
  0x97   :  { %v151_v41 = vpop.permute.xlu0 %150  ;;  %v146_v42 = vpop.permute.xlu1 %145 }
  0x98   :  { %v153_v47 = vmul.f32 %v151_v41, %v47_v26  ;;  %v148_v48 = vadd.f32 %v146_v42, %v142_v44  ;;  %v120_v57 = vmax.f32 %v119_v46, 0.0 }
  0x9a   :  { %v154_v54 = vadd.f32 %v153_v47, %v148_v48 }
  0x9b   :  { %v55_v50 = vpop.permute.xlu1 %54 }
  0x9c   :  { %v90_v51 = vpop.permute.xlu0 %89  ;;  %v57_v52 = vmul.f32 %v55_v50, %v50_v45  ;;  %v155_v1 = vmax.f32 %v154_v54, 0.0 }
  0x9d   :  { %v92_v53 = vmul.f32 %v90_v51, %v85_v49 }
  0x9e   :  { %v58_v55 = vrot.slane %v57_v52, 4 }
  0x9f   :  { %v93_v56 = vrot.slane %v92_v53, 4  ;;  %v125_v58 = vpop.permute.xlu1 %124 }
  0xa0   :  { %v59_v59 = vadd.f32 %v58_v55, %v57_v52  ;;  %v127_v61 = vmul.f32 %v125_v58, %v120_v57 }
  0xa1   :  { %v94_v60 = vadd.f32 %v93_v56, %v92_v53 }
  0xa2   :  { %v60_v62 = vrot.slane %v59_v59, 2  ;;  %v128_v0 = vrot.slane %v127_v61, 4 }
  0xa3   :  { %v95_v63 = vrot.slane %v94_v60, 2  ;;  %v160_v2 = vpop.permute.xlu1 %159 }
  0xa4   :  { %v61_v3 = vadd.f32 %v60_v62, %v59_v59  ;;  %v129_v5 = vadd.f32 %v128_v0, %v127_v61  ;;  %v162_v6 = vmul.f32 %v160_v2, %v155_v1 }
  0xa5   :  { %v96_v4 = vadd.f32 %v95_v63, %v94_v60 }
  0xa6   :  { %v62_v7 = vrot.slane %v61_v3, 1  ;;  %v130_v9 = vrot.slane %v129_v5, 2  ;;  %v163_v10 = vrot.slane %v162_v6, 4 }
  0xa7   :  { %v97_v8 = vrot.slane %v96_v4, 1 }
  0xa8   :  { %v131_v11 = vadd.f32 %v130_v9, %v129_v5  ;;  %v164_v12 = vadd.f32 %v163_v10, %v162_v6  ;;  %v63_v13 = vadd.f32 %v62_v7, %v61_v3 }
  0xa9   :  { %v98_v14 = vadd.f32 %v97_v8, %v96_v4 }
  0xaa   :  { %v132_v15 = vrot.slane %v131_v11, 1  ;;  %v165_v16 = vrot.slane %v164_v12, 2 }
  0xab   :  { %v99_v19 = vadd.f32 %v98_v14, %v63_v13 }
  0xac   :  { %v133_v17 = vadd.f32 %v132_v15, %v131_v11  ;;  %v166_v18 = vadd.f32 %v165_v16, %v164_v12 }
  0xae   :  { %v167_v20 = vrot.slane %v166_v18, 1  ;;  %v134_v21 = vadd.f32 %v133_v17, %v99_v19 }
  0xb0   :  { %v168_v22 = vadd.f32 %v167_v20, %v166_v18 }
  0xb2   :  { %v169_v24 = vadd.f32 %v168_v22, %v134_v21 }
  0xb4   :  { %v172_v25 = vadd.f32 %v171_v23, %v169_v24 }
  0xb6   :  { %v184_v26 = vmul.f32 -1.442695, %v172_v25 }
  0xb8   :  { %193 = vpow2.f32 %v184_v26 }
  0xc2   :  { %v194_v27 = vpop.eup %193 }
  0xc3   :  { %v176_v28 = vadd.f32 1.0, %v194_v27 }
  0xc5   :  { %195 = vrcp.f32 %v176_v28 }
  0xcf   :  { %v196_v29 = vpop.eup %195 }
  0xd0   :  { %179 = vst [vmem:[%s279_s5] sm:$0x1] %v196_v29 }

</bundles_post_ra>
